<compile_context>
chip_gen: v6e
topology: v6e:2x2x1
jax: 0.10.0
libtpu: 0.0.40
codegen_flags: <defaults>
</compile_context>

<pallas_src>
import jax
import jax.numpy as jnp
from jax.experimental import pallas as pl
from jax.experimental.pallas import tpu as pltpu


def _focus_conv_kernel(x_ref, w_ref, b_ref, o_ref):
    # x_ref: (C, 2*TI, W)   2*TI consecutive input rows of one image
    # w_ref: (4, Cout, C)   resident weight slices, index q = 2*dy + dx
    # b_ref: (Cout, 1)      resident bias (f32)
    # o_ref: (TI, Cout, W)  TI output rows; only even lanes are meaningful
    ti, _, w_lanes = o_ref.shape
    w00 = w_ref[0]   # dy=0, dx=0
    w01 = w_ref[1]   # dy=0, dx=1
    w10 = w_ref[2]   # dy=1, dx=0
    w11 = w_ref[3]   # dy=1, dx=1
    b = b_ref[...]   # (Cout, 1) f32

    for r in range(ti):                      # static unroll; TI is small (<=32)
        x0 = x_ref[:, 2 * r, :]              # (C, W)  input row 2i   (dy = 0)
        x1 = x_ref[:, 2 * r + 1, :]          # (C, W)  input row 2i+1 (dy = 1)
        # dx = 0 / dx = 1 partial sums over the full W lanes (f32 MXU accum).
        s0 = (jnp.dot(w00, x0, preferred_element_type=jnp.float32) +
              jnp.dot(w10, x1, preferred_element_type=jnp.float32))
        s1 = (jnp.dot(w01, x0, preferred_element_type=jnp.float32) +
              jnp.dot(w11, x1, preferred_element_type=jnp.float32))
        # out[:, 2j] = s0[:, 2j] + s1[:, 2j+1]  -> shift s1 left by one lane.
        s1_shift = pltpu.roll(s1, shift=w_lanes - 1, axis=1)   # == jnp.roll(s1, -1, 1)
        y = s0 + s1_shift + b
        o_ref[r, :, :] = y.astype(o_ref.dtype)


def _choose_row_tile(h2, bytes_per_out_row, budget=6 << 20, max_ti=32):
    """Largest TI <= max_ti with TI | H2, (2*TI) % 8 == 0 (or TI == H2 -> full H),
    and an input block that stays well under the default VMEM window."""
    best = None
    for d in range(1, min(h2, max_ti) + 1):
        if h2 % d:
            continue
        if (2 * d) % 8 and d != h2:
            continue
        if d * bytes_per_out_row > budget:
            continue
        best = d
    return best if best is not None else h2


def focus_downsample_2x(x, weight, bias):
    """x: (N, C, H, W) NCHW; weight: (C_out, 4*C, 1, 1); bias: (C_out,)."""
    N, C, H, W = x.shape
    # NOTE: the PyTorch source's `assert H // 2 == 0` is a typo for `H % 2 == 0`;
    # we enforce the evenness the forward actually relies on.
    assert H % 2 == 0 and W % 2 == 0
    H2, W2 = H // 2, W // 2
    Cout, K = weight.shape[0], weight.shape[1]
    assert K == 4 * C and weight.shape[2:] == (1, 1)

    # torch.cat channel order: q=0->(dy0,dx0), q=1->(dy0,dx1), q=2->(dy1,dx0), q=3->(dy1,dx1)
    w4 = jnp.transpose(weight.reshape(Cout, 4, C), (1, 0, 2)).astype(x.dtype)  # (4, Cout, C)
    b2 = bias.reshape(Cout, 1).astype(jnp.float32)

    itemsize = jnp.dtype(x.dtype).itemsize
    ti = _choose_row_tile(H2, bytes_per_out_row=C * 2 * W * itemsize)
    grid = (N, H2 // ti)

    cost = pl.CostEstimate(
        flops=int(8 * N * H2 * W * C * Cout),
        transcendentals=0,
        bytes_accessed=int(
            (N * C * H * W + N * H2 * Cout * W + 4 * Cout * C + Cout) * itemsize),
    )

    out_full = pl.pallas_call(
        _focus_conv_kernel,
        out_shape=jax.ShapeDtypeStruct((N, H2, Cout, W), x.dtype),
        grid_spec=pltpu.PrefetchScalarGridSpec(
            num_scalar_prefetch=0,
            grid=grid,
            in_specs=[
                pl.BlockSpec((None, C, 2 * ti, W), lambda n, i: (n, 0, i, 0)),  # row block of x
                pl.BlockSpec((4, Cout, C), lambda n, i: (0, 0, 0)),             # resident weight
                pl.BlockSpec((Cout, 1), lambda n, i: (0, 0)),                   # resident bias
            ],
            out_specs=pl.BlockSpec((None, ti, Cout, W), lambda n, i: (n, i, 0, 0)),
        ),
        compiler_params=pltpu.CompilerParams(
            dimension_semantics=("parallel", "parallel")),
        cost_estimate=cost,
    )(x, w4, b2)

    # Keep the even lanes (the true output columns) and restore NCHW.  XLA fuses
    # the slice + transpose into one small copy over the already-halved tensor.
    return jnp.transpose(out_full[:, :, :, 0::2], (0, 2, 1, 3))


def _reference(x, weight, bias):
    # Pure-JAX reference of the same forward (for correctness checking).
    x4 = jnp.concatenate(
        [x[:, :, ::2, ::2], x[:, :, ::2, 1::2],
         x[:, :, 1::2, ::2], x[:, :, 1::2, 1::2]],
        axis=1)
    w = weight[:, :, 0, 0]  # (Cout, K)
    return jnp.einsum("nkhw,ok->nohw", x4, w) + bias[None, :, None, None]


if __name__ == "__main__":
    key = jax.random.PRNGKey(0)
    k_x, k_w, k_b = jax.random.split(key, 3)

    in_c = 4
    N, H, W = 2, 16, 16
    x = jax.random.normal(k_x, (N, in_c, H, W), dtype=jnp.float32)

    # Deterministic synthetic parameters for Conv2d(4*in_c, in_c, 1, 1, 0).
    weight = 0.1 * jax.random.normal(k_w, (in_c, 4 * in_c, 1, 1), dtype=jnp.float32)
    bias = 0.1 * jax.random.normal(k_b, (in_c,), dtype=jnp.float32)

    fwd = jax.jit(focus_downsample_2x)
    out = jax.block_until_ready(fwd(x, weight, bias))

    ref = _reference(x, weight, bias)
    assert out.shape == (N, in_c, H // 2, W // 2)
    assert jnp.allclose(out, ref, atol=1e-5, rtol=1e-5)

    print("KERNEL_OK")
</pallas_src>

<mosaic_0001>
module attributes {stable_mosaic.version = 11 : i64} {
  func.func @_focus_conv_kernel(%arg0: i32, %arg1: i32, %arg2: memref<1x4x16x16xf32, #tpu.memory_space<vmem>>, %arg3: memref<4x4x4xf32, #tpu.memory_space<vmem>>, %arg4: memref<4x1xf32, #tpu.memory_space<vmem>>, %arg5: memref<1x8x4x16xf32, #tpu.memory_space<vmem>>) attributes {dimension_semantics = [#tpu.dimension_semantics<parallel>, #tpu.dimension_semantics<parallel>], iteration_bounds = array<i64: 2, 1>, scalar_prefetch = 0 : i64, scratch_operands = 0 : i64, tpu.core_type = #tpu.core_type<tc>, window_params = [{transform_indices = @transform_0, window_bounds = array<i64: 1, 4, 16, 16>}, {pipeline_mode = #tpu.pipeline_mode<synchronous>, transform_indices = @transform_1, window_bounds = array<i64: 4, 4, 4>}, {pipeline_mode = #tpu.pipeline_mode<synchronous>, transform_indices = @transform_2, window_bounds = array<i64: 4, 1>}, {transform_indices = @transform_3, window_bounds = array<i64: 1, 8, 4, 16>}]} {
    %c0 = arith.constant 0 : index
    %c0_0 = arith.constant 0 : index
    %c0_1 = arith.constant 0 : index
    %0 = vector.load %arg3[%c0, %c0_0, %c0_1] : memref<4x4x4xf32, #tpu.memory_space<vmem>>, vector<1x4x4xf32>
    %1 = vector.shape_cast %0 : vector<1x4x4xf32> to vector<4x4xf32>
    %c1 = arith.constant 1 : index
    %c0_2 = arith.constant 0 : index
    %c0_3 = arith.constant 0 : index
    %2 = vector.load %arg3[%c1, %c0_2, %c0_3] : memref<4x4x4xf32, #tpu.memory_space<vmem>>, vector<1x4x4xf32>
    %3 = vector.shape_cast %2 : vector<1x4x4xf32> to vector<4x4xf32>
    %c2 = arith.constant 2 : index
    %c0_4 = arith.constant 0 : index
    %c0_5 = arith.constant 0 : index
    %4 = vector.load %arg3[%c2, %c0_4, %c0_5] : memref<4x4x4xf32, #tpu.memory_space<vmem>>, vector<1x4x4xf32>
    %5 = vector.shape_cast %4 : vector<1x4x4xf32> to vector<4x4xf32>
    %c3 = arith.constant 3 : index
    %c0_6 = arith.constant 0 : index
    %c0_7 = arith.constant 0 : index
    %6 = vector.load %arg3[%c3, %c0_6, %c0_7] : memref<4x4x4xf32, #tpu.memory_space<vmem>>, vector<1x4x4xf32>
    %7 = vector.shape_cast %6 : vector<1x4x4xf32> to vector<4x4xf32>
    %c0_8 = arith.constant 0 : index
    %c0_9 = arith.constant 0 : index
    %8 = vector.load %arg4[%c0_8, %c0_9] : memref<4x1xf32, #tpu.memory_space<vmem>>, vector<4x1xf32>
    %c0_10 = arith.constant 0 : index
    %c0_11 = arith.constant 0 : index
    %c0_12 = arith.constant 0 : index
    %c0_13 = arith.constant 0 : index
    %9 = vector.load %arg2[%c0_10, %c0_11, %c0_12, %c0_13] : memref<1x4x16x16xf32, #tpu.memory_space<vmem>>, vector<1x4x1x16xf32>
    %10 = vector.shape_cast %9 : vector<1x4x1x16xf32> to vector<4x16xf32>
    %c0_14 = arith.constant 0 : index
    %c0_15 = arith.constant 0 : index
    %c1_16 = arith.constant 1 : index
    %c0_17 = arith.constant 0 : index
    %11 = vector.load %arg2[%c0_14, %c0_15, %c1_16, %c0_17] : memref<1x4x16x16xf32, #tpu.memory_space<vmem>>, vector<1x4x1x16xf32>
    %12 = vector.shape_cast %11 : vector<1x4x1x16xf32> to vector<4x16xf32>
    %cst = arith.constant dense<0.000000e+00> : vector<4x16xf32>
    %13 = tpu.matmul %1, %10, %cst {dimension_numbers = #tpu.dot_dimension_numbers<[1], [0], [0], [1], [0, 0, 1, 1], [], []>} : vector<4x4xf32>, vector<4x16xf32>, vector<4x16xf32> -> vector<4x16xf32>
    %cst_18 = arith.constant dense<0.000000e+00> : vector<4x16xf32>
    %14 = tpu.matmul %5, %12, %cst_18 {dimension_numbers = #tpu.dot_dimension_numbers<[1], [0], [0], [1], [0, 0, 1, 1], [], []>} : vector<4x4xf32>, vector<4x16xf32>, vector<4x16xf32> -> vector<4x16xf32>
    %15 = arith.addf %13, %14 : vector<4x16xf32>
    %cst_19 = arith.constant dense<0.000000e+00> : vector<4x16xf32>
    %16 = tpu.matmul %3, %10, %cst_19 {dimension_numbers = #tpu.dot_dimension_numbers<[1], [0], [0], [1], [0, 0, 1, 1], [], []>} : vector<4x4xf32>, vector<4x16xf32>, vector<4x16xf32> -> vector<4x16xf32>
    %cst_20 = arith.constant dense<0.000000e+00> : vector<4x16xf32>
    %17 = tpu.matmul %7, %12, %cst_20 {dimension_numbers = #tpu.dot_dimension_numbers<[1], [0], [0], [1], [0, 0, 1, 1], [], []>} : vector<4x4xf32>, vector<4x16xf32>, vector<4x16xf32> -> vector<4x16xf32>
    %18 = arith.addf %16, %17 : vector<4x16xf32>
    %c15_i32 = arith.constant 15 : i32
    %19 = tpu.dynamic_rotate %18 by %c15_i32 dim 1 : vector<4x16xf32>, i32 -> vector<4x16xf32>
    %20 = arith.addf %15, %19 : vector<4x16xf32>
    %21 = vector.broadcast %8 : vector<4x1xf32> to vector<4x16xf32>
    %22 = arith.addf %20, %21 : vector<4x16xf32>
    %c0_21 = arith.constant 0 : index
    %c0_22 = arith.constant 0 : index
    %c0_23 = arith.constant 0 : index
    %c0_24 = arith.constant 0 : index
    %23 = vector.load %arg5[%c0_21, %c0_22, %c0_23, %c0_24] : memref<1x8x4x16xf32, #tpu.memory_space<vmem>>, vector<1x1x4x16xf32>
    %24 = vector.shape_cast %23 : vector<1x1x4x16xf32> to vector<4x16xf32>
    %25 = vector.shape_cast %22 : vector<4x16xf32> to vector<1x1x4x16xf32>
    tpu.vector_store %arg5[%c0_21, %c0_22, %c0_23, %c0_24], %25 {strides = array<i32>} : memref<1x8x4x16xf32, #tpu.memory_space<vmem>>, vector<1x1x4x16xf32>,
    %c0_25 = arith.constant 0 : index
    %c0_26 = arith.constant 0 : index
    %c2_27 = arith.constant 2 : index
    %c0_28 = arith.constant 0 : index
    %26 = vector.load %arg2[%c0_25, %c0_26, %c2_27, %c0_28] : memref<1x4x16x16xf32, #tpu.memory_space<vmem>>, vector<1x4x1x16xf32>
    %27 = vector.shape_cast %26 : vector<1x4x1x16xf32> to vector<4x16xf32>
    %c0_29 = arith.constant 0 : index
    %c0_30 = arith.constant 0 : index
    %c3_31 = arith.constant 3 : index
    %c0_32 = arith.constant 0 : index
    %28 = vector.load %arg2[%c0_29, %c0_30, %c3_31, %c0_32] : memref<1x4x16x16xf32, #tpu.memory_space<vmem>>, vector<1x4x1x16xf32>
    %29 = vector.shape_cast %28 : vector<1x4x1x16xf32> to vector<4x16xf32>
    %cst_33 = arith.constant dense<0.000000e+00> : vector<4x16xf32>
    %30 = tpu.matmul %1, %27, %cst_33 {dimension_numbers = #tpu.dot_dimension_numbers<[1], [0], [0], [1], [0, 0, 1, 1], [], []>} : vector<4x4xf32>, vector<4x16xf32>, vector<4x16xf32> -> vector<4x16xf32>
    %cst_34 = arith.constant dense<0.000000e+00> : vector<4x16xf32>
    %31 = tpu.matmul %5, %29, %cst_34 {dimension_numbers = #tpu.dot_dimension_numbers<[1], [0], [0], [1], [0, 0, 1, 1], [], []>} : vector<4x4xf32>, vector<4x16xf32>, vector<4x16xf32> -> vector<4x16xf32>
    %32 = arith.addf %30, %31 : vector<4x16xf32>
    %cst_35 = arith.constant dense<0.000000e+00> : vector<4x16xf32>
    %33 = tpu.matmul %3, %27, %cst_35 {dimension_numbers = #tpu.dot_dimension_numbers<[1], [0], [0], [1], [0, 0, 1, 1], [], []>} : vector<4x4xf32>, vector<4x16xf32>, vector<4x16xf32> -> vector<4x16xf32>
    %cst_36 = arith.constant dense<0.000000e+00> : vector<4x16xf32>
    %34 = tpu.matmul %7, %29, %cst_36 {dimension_numbers = #tpu.dot_dimension_numbers<[1], [0], [0], [1], [0, 0, 1, 1], [], []>} : vector<4x4xf32>, vector<4x16xf32>, vector<4x16xf32> -> vector<4x16xf32>
    %35 = arith.addf %33, %34 : vector<4x16xf32>
    %c15_i32_37 = arith.constant 15 : i32
    %36 = tpu.dynamic_rotate %35 by %c15_i32_37 dim 1 : vector<4x16xf32>, i32 -> vector<4x16xf32>
    %37 = arith.addf %32, %36 : vector<4x16xf32>
    %38 = vector.broadcast %8 : vector<4x1xf32> to vector<4x16xf32>
    %39 = arith.addf %37, %38 : vector<4x16xf32>
    %c0_38 = arith.constant 0 : index
    %c1_39 = arith.constant 1 : index
    %c0_40 = arith.constant 0 : index
    %c0_41 = arith.constant 0 : index
    %40 = vector.load %arg5[%c0_38, %c1_39, %c0_40, %c0_41] : memref<1x8x4x16xf32, #tpu.memory_space<vmem>>, vector<1x1x4x16xf32>
    %41 = vector.shape_cast %40 : vector<1x1x4x16xf32> to vector<4x16xf32>
    %42 = vector.shape_cast %39 : vector<4x16xf32> to vector<1x1x4x16xf32>
    tpu.vector_store %arg5[%c0_38, %c1_39, %c0_40, %c0_41], %42 {strides = array<i32>} : memref<1x8x4x16xf32, #tpu.memory_space<vmem>>, vector<1x1x4x16xf32>,
    %c0_42 = arith.constant 0 : index
    %c0_43 = arith.constant 0 : index
    %c4 = arith.constant 4 : index
    %c0_44 = arith.constant 0 : index
    %43 = vector.load %arg2[%c0_42, %c0_43, %c4, %c0_44] : memref<1x4x16x16xf32, #tpu.memory_space<vmem>>, vector<1x4x1x16xf32>
    %44 = vector.shape_cast %43 : vector<1x4x1x16xf32> to vector<4x16xf32>
    %c0_45 = arith.constant 0 : index
    %c0_46 = arith.constant 0 : index
    %c5 = arith.constant 5 : index
    %c0_47 = arith.constant 0 : index
    %45 = vector.load %arg2[%c0_45, %c0_46, %c5, %c0_47] : memref<1x4x16x16xf32, #tpu.memory_space<vmem>>, vector<1x4x1x16xf32>
    %46 = vector.shape_cast %45 : vector<1x4x1x16xf32> to vector<4x16xf32>
    %cst_48 = arith.constant dense<0.000000e+00> : vector<4x16xf32>
    %47 = tpu.matmul %1, %44, %cst_48 {dimension_numbers = #tpu.dot_dimension_numbers<[1], [0], [0], [1], [0, 0, 1, 1], [], []>} : vector<4x4xf32>, vector<4x16xf32>, vector<4x16xf32> -> vector<4x16xf32>
    %cst_49 = arith.constant dense<0.000000e+00> : vector<4x16xf32>
    %48 = tpu.matmul %5, %46, %cst_49 {dimension_numbers = #tpu.dot_dimension_numbers<[1], [0], [0], [1], [0, 0, 1, 1], [], []>} : vector<4x4xf32>, vector<4x16xf32>, vector<4x16xf32> -> vector<4x16xf32>
    %49 = arith.addf %47, %48 : vector<4x16xf32>
    %cst_50 = arith.constant dense<0.000000e+00> : vector<4x16xf32>
    %50 = tpu.matmul %3, %44, %cst_50 {dimension_numbers = #tpu.dot_dimension_numbers<[1], [0], [0], [1], [0, 0, 1, 1], [], []>} : vector<4x4xf32>, vector<4x16xf32>, vector<4x16xf32> -> vector<4x16xf32>
    %cst_51 = arith.constant dense<0.000000e+00> : vector<4x16xf32>
    %51 = tpu.matmul %7, %46, %cst_51 {dimension_numbers = #tpu.dot_dimension_numbers<[1], [0], [0], [1], [0, 0, 1, 1], [], []>} : vector<4x4xf32>, vector<4x16xf32>, vector<4x16xf32> -> vector<4x16xf32>
    %52 = arith.addf %50, %51 : vector<4x16xf32>
    %c15_i32_52 = arith.constant 15 : i32
    %53 = tpu.dynamic_rotate %52 by %c15_i32_52 dim 1 : vector<4x16xf32>, i32 -> vector<4x16xf32>
    %54 = arith.addf %49, %53 : vector<4x16xf32>
    %55 = vector.broadcast %8 : vector<4x1xf32> to vector<4x16xf32>
    %56 = arith.addf %54, %55 : vector<4x16xf32>
    %c0_53 = arith.constant 0 : index
    %c2_54 = arith.constant 2 : index
    %c0_55 = arith.constant 0 : index
    %c0_56 = arith.constant 0 : index
    %57 = vector.load %arg5[%c0_53, %c2_54, %c0_55, %c0_56] : memref<1x8x4x16xf32, #tpu.memory_space<vmem>>, vector<1x1x4x16xf32>
    %58 = vector.shape_cast %57 : vector<1x1x4x16xf32> to vector<4x16xf32>
    %59 = vector.shape_cast %56 : vector<4x16xf32> to vector<1x1x4x16xf32>
    tpu.vector_store %arg5[%c0_53, %c2_54, %c0_55, %c0_56], %59 {strides = array<i32>} : memref<1x8x4x16xf32, #tpu.memory_space<vmem>>, vector<1x1x4x16xf32>,
    %c0_57 = arith.constant 0 : index
    %c0_58 = arith.constant 0 : index
    %c6 = arith.constant 6 : index
    %c0_59 = arith.constant 0 : index
    %60 = vector.load %arg2[%c0_57, %c0_58, %c6, %c0_59] : memref<1x4x16x16xf32, #tpu.memory_space<vmem>>, vector<1x4x1x16xf32>
    %61 = vector.shape_cast %60 : vector<1x4x1x16xf32> to vector<4x16xf32>
    %c0_60 = arith.constant 0 : index
    %c0_61 = arith.constant 0 : index
    %c7 = arith.constant 7 : index
    %c0_62 = arith.constant 0 : index
    %62 = vector.load %arg2[%c0_60, %c0_61, %c7, %c0_62] : memref<1x4x16x16xf32, #tpu.memory_space<vmem>>, vector<1x4x1x16xf32>
    %63 = vector.shape_cast %62 : vector<1x4x1x16xf32> to vector<4x16xf32>
    %cst_63 = arith.constant dense<0.000000e+00> : vector<4x16xf32>
    %64 = tpu.matmul %1, %61, %cst_63 {dimension_numbers = #tpu.dot_dimension_numbers<[1], [0], [0], [1], [0, 0, 1, 1], [], []>} : vector<4x4xf32>, vector<4x16xf32>, vector<4x16xf32> -> vector<4x16xf32>
    %cst_64 = arith.constant dense<0.000000e+00> : vector<4x16xf32>
    %65 = tpu.matmul %5, %63, %cst_64 {dimension_numbers = #tpu.dot_dimension_numbers<[1], [0], [0], [1], [0, 0, 1, 1], [], []>} : vector<4x4xf32>, vector<4x16xf32>, vector<4x16xf32> -> vector<4x16xf32>
    %66 = arith.addf %64, %65 : vector<4x16xf32>
    %cst_65 = arith.constant dense<0.000000e+00> : vector<4x16xf32>
    %67 = tpu.matmul %3, %61, %cst_65 {dimension_numbers = #tpu.dot_dimension_numbers<[1], [0], [0], [1], [0, 0, 1, 1], [], []>} : vector<4x4xf32>, vector<4x16xf32>, vector<4x16xf32> -> vector<4x16xf32>
    %cst_66 = arith.constant dense<0.000000e+00> : vector<4x16xf32>
    %68 = tpu.matmul %7, %63, %cst_66 {dimension_numbers = #tpu.dot_dimension_numbers<[1], [0], [0], [1], [0, 0, 1, 1], [], []>} : vector<4x4xf32>, vector<4x16xf32>, vector<4x16xf32> -> vector<4x16xf32>
    %69 = arith.addf %67, %68 : vector<4x16xf32>
    %c15_i32_67 = arith.constant 15 : i32
    %70 = tpu.dynamic_rotate %69 by %c15_i32_67 dim 1 : vector<4x16xf32>, i32 -> vector<4x16xf32>
    %71 = arith.addf %66, %70 : vector<4x16xf32>
    %72 = vector.broadcast %8 : vector<4x1xf32> to vector<4x16xf32>
    %73 = arith.addf %71, %72 : vector<4x16xf32>
    %c0_68 = arith.constant 0 : index
    %c3_69 = arith.constant 3 : index
    %c0_70 = arith.constant 0 : index
    %c0_71 = arith.constant 0 : index
    %74 = vector.load %arg5[%c0_68, %c3_69, %c0_70, %c0_71] : memref<1x8x4x16xf32, #tpu.memory_space<vmem>>, vector<1x1x4x16xf32>
    %75 = vector.shape_cast %74 : vector<1x1x4x16xf32> to vector<4x16xf32>
    %76 = vector.shape_cast %73 : vector<4x16xf32> to vector<1x1x4x16xf32>
    tpu.vector_store %arg5[%c0_68, %c3_69, %c0_70, %c0_71], %76 {strides = array<i32>} : memref<1x8x4x16xf32, #tpu.memory_space<vmem>>, vector<1x1x4x16xf32>,
    %c0_72 = arith.constant 0 : index
    %c0_73 = arith.constant 0 : index
    %c8 = arith.constant 8 : index
    %c0_74 = arith.constant 0 : index
    %77 = vector.load %arg2[%c0_72, %c0_73, %c8, %c0_74] : memref<1x4x16x16xf32, #tpu.memory_space<vmem>>, vector<1x4x1x16xf32>
    %78 = vector.shape_cast %77 : vector<1x4x1x16xf32> to vector<4x16xf32>
    %c0_75 = arith.constant 0 : index
    %c0_76 = arith.constant 0 : index
    %c9 = arith.constant 9 : index
    %c0_77 = arith.constant 0 : index
    %79 = vector.load %arg2[%c0_75, %c0_76, %c9, %c0_77] : memref<1x4x16x16xf32, #tpu.memory_space<vmem>>, vector<1x4x1x16xf32>
    %80 = vector.shape_cast %79 : vector<1x4x1x16xf32> to vector<4x16xf32>
    %cst_78 = arith.constant dense<0.000000e+00> : vector<4x16xf32>
    %81 = tpu.matmul %1, %78, %cst_78 {dimension_numbers = #tpu.dot_dimension_numbers<[1], [0], [0], [1], [0, 0, 1, 1], [], []>} : vector<4x4xf32>, vector<4x16xf32>, vector<4x16xf32> -> vector<4x16xf32>
    %cst_79 = arith.constant dense<0.000000e+00> : vector<4x16xf32>
    %82 = tpu.matmul %5, %80, %cst_79 {dimension_numbers = #tpu.dot_dimension_numbers<[1], [0], [0], [1], [0, 0, 1, 1], [], []>} : vector<4x4xf32>, vector<4x16xf32>, vector<4x16xf32> -> vector<4x16xf32>
    %83 = arith.addf %81, %82 : vector<4x16xf32>
    %cst_80 = arith.constant dense<0.000000e+00> : vector<4x16xf32>
    %84 = tpu.matmul %3, %78, %cst_80 {dimension_numbers = #tpu.dot_dimension_numbers<[1], [0], [0], [1], [0, 0, 1, 1], [], []>} : vector<4x4xf32>, vector<4x16xf32>, vector<4x16xf32> -> vector<4x16xf32>
    %cst_81 = arith.constant dense<0.000000e+00> : vector<4x16xf32>
    %85 = tpu.matmul %7, %80, %cst_81 {dimension_numbers = #tpu.dot_dimension_numbers<[1], [0], [0], [1], [0, 0, 1, 1], [], []>} : vector<4x4xf32>, vector<4x16xf32>, vector<4x16xf32> -> vector<4x16xf32>
    %86 = arith.addf %84, %85 : vector<4x16xf32>
    %c15_i32_82 = arith.constant 15 : i32
    %87 = tpu.dynamic_rotate %86 by %c15_i32_82 dim 1 : vector<4x16xf32>, i32 -> vector<4x16xf32>
    %88 = arith.addf %83, %87 : vector<4x16xf32>
    %89 = vector.broadcast %8 : vector<4x1xf32> to vector<4x16xf32>
    %90 = arith.addf %88, %89 : vector<4x16xf32>
    %c0_83 = arith.constant 0 : index
    %c4_84 = arith.constant 4 : index
    %c0_85 = arith.constant 0 : index
    %c0_86 = arith.constant 0 : index
    %91 = vector.load %arg5[%c0_83, %c4_84, %c0_85, %c0_86] : memref<1x8x4x16xf32, #tpu.memory_space<vmem>>, vector<1x1x4x16xf32>
    %92 = vector.shape_cast %91 : vector<1x1x4x16xf32> to vector<4x16xf32>
    %93 = vector.shape_cast %90 : vector<4x16xf32> to vector<1x1x4x16xf32>
    tpu.vector_store %arg5[%c0_83, %c4_84, %c0_85, %c0_86], %93 {strides = array<i32>} : memref<1x8x4x16xf32, #tpu.memory_space<vmem>>, vector<1x1x4x16xf32>,
    %c0_87 = arith.constant 0 : index
    %c0_88 = arith.constant 0 : index
    %c10 = arith.constant 10 : index
    %c0_89 = arith.constant 0 : index
    %94 = vector.load %arg2[%c0_87, %c0_88, %c10, %c0_89] : memref<1x4x16x16xf32, #tpu.memory_space<vmem>>, vector<1x4x1x16xf32>
    %95 = vector.shape_cast %94 : vector<1x4x1x16xf32> to vector<4x16xf32>
    %c0_90 = arith.constant 0 : index
    %c0_91 = arith.constant 0 : index
    %c11 = arith.constant 11 : index
    %c0_92 = arith.constant 0 : index
    %96 = vector.load %arg2[%c0_90, %c0_91, %c11, %c0_92] : memref<1x4x16x16xf32, #tpu.memory_space<vmem>>, vector<1x4x1x16xf32>
    %97 = vector.shape_cast %96 : vector<1x4x1x16xf32> to vector<4x16xf32>
    %cst_93 = arith.constant dense<0.000000e+00> : vector<4x16xf32>
    %98 = tpu.matmul %1, %95, %cst_93 {dimension_numbers = #tpu.dot_dimension_numbers<[1], [0], [0], [1], [0, 0, 1, 1], [], []>} : vector<4x4xf32>, vector<4x16xf32>, vector<4x16xf32> -> vector<4x16xf32>
    %cst_94 = arith.constant dense<0.000000e+00> : vector<4x16xf32>
    %99 = tpu.matmul %5, %97, %cst_94 {dimension_numbers = #tpu.dot_dimension_numbers<[1], [0], [0], [1], [0, 0, 1, 1], [], []>} : vector<4x4xf32>, vector<4x16xf32>, vector<4x16xf32> -> vector<4x16xf32>
    %100 = arith.addf %98, %99 : vector<4x16xf32>
    %cst_95 = arith.constant dense<0.000000e+00> : vector<4x16xf32>
    %101 = tpu.matmul %3, %95, %cst_95 {dimension_numbers = #tpu.dot_dimension_numbers<[1], [0], [0], [1], [0, 0, 1, 1], [], []>} : vector<4x4xf32>, vector<4x16xf32>, vector<4x16xf32> -> vector<4x16xf32>
    %cst_96 = arith.constant dense<0.000000e+00> : vector<4x16xf32>
    %102 = tpu.matmul %7, %97, %cst_96 {dimension_numbers = #tpu.dot_dimension_numbers<[1], [0], [0], [1], [0, 0, 1, 1], [], []>} : vector<4x4xf32>, vector<4x16xf32>, vector<4x16xf32> -> vector<4x16xf32>
    %103 = arith.addf %101, %102 : vector<4x16xf32>
    %c15_i32_97 = arith.constant 15 : i32
    %104 = tpu.dynamic_rotate %103 by %c15_i32_97 dim 1 : vector<4x16xf32>, i32 -> vector<4x16xf32>
    %105 = arith.addf %100, %104 : vector<4x16xf32>
    %106 = vector.broadcast %8 : vector<4x1xf32> to vector<4x16xf32>
    %107 = arith.addf %105, %106 : vector<4x16xf32>
    %c0_98 = arith.constant 0 : index
    %c5_99 = arith.constant 5 : index
    %c0_100 = arith.constant 0 : index
    %c0_101 = arith.constant 0 : index
    %108 = vector.load %arg5[%c0_98, %c5_99, %c0_100, %c0_101] : memref<1x8x4x16xf32, #tpu.memory_space<vmem>>, vector<1x1x4x16xf32>
    %109 = vector.shape_cast %108 : vector<1x1x4x16xf32> to vector<4x16xf32>
    %110 = vector.shape_cast %107 : vector<4x16xf32> to vector<1x1x4x16xf32>
    tpu.vector_store %arg5[%c0_98, %c5_99, %c0_100, %c0_101], %110 {strides = array<i32>} : memref<1x8x4x16xf32, #tpu.memory_space<vmem>>, vector<1x1x4x16xf32>,
    %c0_102 = arith.constant 0 : index
    %c0_103 = arith.constant 0 : index
    %c12 = arith.constant 12 : index
    %c0_104 = arith.constant 0 : index
    %111 = vector.load %arg2[%c0_102, %c0_103, %c12, %c0_104] : memref<1x4x16x16xf32, #tpu.memory_space<vmem>>, vector<1x4x1x16xf32>
    %112 = vector.shape_cast %111 : vector<1x4x1x16xf32> to vector<4x16xf32>
    %c0_105 = arith.constant 0 : index
    %c0_106 = arith.constant 0 : index
    %c13 = arith.constant 13 : index
    %c0_107 = arith.constant 0 : index
    %113 = vector.load %arg2[%c0_105, %c0_106, %c13, %c0_107] : memref<1x4x16x16xf32, #tpu.memory_space<vmem>>, vector<1x4x1x16xf32>
    %114 = vector.shape_cast %113 : vector<1x4x1x16xf32> to vector<4x16xf32>
    %cst_108 = arith.constant dense<0.000000e+00> : vector<4x16xf32>
    %115 = tpu.matmul %1, %112, %cst_108 {dimension_numbers = #tpu.dot_dimension_numbers<[1], [0], [0], [1], [0, 0, 1, 1], [], []>} : vector<4x4xf32>, vector<4x16xf32>, vector<4x16xf32> -> vector<4x16xf32>
    %cst_109 = arith.constant dense<0.000000e+00> : vector<4x16xf32>
    %116 = tpu.matmul %5, %114, %cst_109 {dimension_numbers = #tpu.dot_dimension_numbers<[1], [0], [0], [1], [0, 0, 1, 1], [], []>} : vector<4x4xf32>, vector<4x16xf32>, vector<4x16xf32> -> vector<4x16xf32>
    %117 = arith.addf %115, %116 : vector<4x16xf32>
    %cst_110 = arith.constant dense<0.000000e+00> : vector<4x16xf32>
    %118 = tpu.matmul %3, %112, %cst_110 {dimension_numbers = #tpu.dot_dimension_numbers<[1], [0], [0], [1], [0, 0, 1, 1], [], []>} : vector<4x4xf32>, vector<4x16xf32>, vector<4x16xf32> -> vector<4x16xf32>
    %cst_111 = arith.constant dense<0.000000e+00> : vector<4x16xf32>
    %119 = tpu.matmul %7, %114, %cst_111 {dimension_numbers = #tpu.dot_dimension_numbers<[1], [0], [0], [1], [0, 0, 1, 1], [], []>} : vector<4x4xf32>, vector<4x16xf32>, vector<4x16xf32> -> vector<4x16xf32>
    %120 = arith.addf %118, %119 : vector<4x16xf32>
    %c15_i32_112 = arith.constant 15 : i32
    %121 = tpu.dynamic_rotate %120 by %c15_i32_112 dim 1 : vector<4x16xf32>, i32 -> vector<4x16xf32>
    %122 = arith.addf %117, %121 : vector<4x16xf32>
    %123 = vector.broadcast %8 : vector<4x1xf32> to vector<4x16xf32>
    %124 = arith.addf %122, %123 : vector<4x16xf32>
    %c0_113 = arith.constant 0 : index
    %c6_114 = arith.constant 6 : index
    %c0_115 = arith.constant 0 : index
    %c0_116 = arith.constant 0 : index
    %125 = vector.load %arg5[%c0_113, %c6_114, %c0_115, %c0_116] : memref<1x8x4x16xf32, #tpu.memory_space<vmem>>, vector<1x1x4x16xf32>
    %126 = vector.shape_cast %125 : vector<1x1x4x16xf32> to vector<4x16xf32>
    %127 = vector.shape_cast %124 : vector<4x16xf32> to vector<1x1x4x16xf32>
    tpu.vector_store %arg5[%c0_113, %c6_114, %c0_115, %c0_116], %127 {strides = array<i32>} : memref<1x8x4x16xf32, #tpu.memory_space<vmem>>, vector<1x1x4x16xf32>,
    %c0_117 = arith.constant 0 : index
    %c0_118 = arith.constant 0 : index
    %c14 = arith.constant 14 : index
    %c0_119 = arith.constant 0 : index
    %128 = vector.load %arg2[%c0_117, %c0_118, %c14, %c0_119] : memref<1x4x16x16xf32, #tpu.memory_space<vmem>>, vector<1x4x1x16xf32>
    %129 = vector.shape_cast %128 : vector<1x4x1x16xf32> to vector<4x16xf32>
    %c0_120 = arith.constant 0 : index
    %c0_121 = arith.constant 0 : index
    %c15 = arith.constant 15 : index
    %c0_122 = arith.constant 0 : index
    %130 = vector.load %arg2[%c0_120, %c0_121, %c15, %c0_122] : memref<1x4x16x16xf32, #tpu.memory_space<vmem>>, vector<1x4x1x16xf32>
    %131 = vector.shape_cast %130 : vector<1x4x1x16xf32> to vector<4x16xf32>
    %cst_123 = arith.constant dense<0.000000e+00> : vector<4x16xf32>
    %132 = tpu.matmul %1, %129, %cst_123 {dimension_numbers = #tpu.dot_dimension_numbers<[1], [0], [0], [1], [0, 0, 1, 1], [], []>} : vector<4x4xf32>, vector<4x16xf32>, vector<4x16xf32> -> vector<4x16xf32>
    %cst_124 = arith.constant dense<0.000000e+00> : vector<4x16xf32>
    %133 = tpu.matmul %5, %131, %cst_124 {dimension_numbers = #tpu.dot_dimension_numbers<[1], [0], [0], [1], [0, 0, 1, 1], [], []>} : vector<4x4xf32>, vector<4x16xf32>, vector<4x16xf32> -> vector<4x16xf32>
    %134 = arith.addf %132, %133 : vector<4x16xf32>
    %cst_125 = arith.constant dense<0.000000e+00> : vector<4x16xf32>
    %135 = tpu.matmul %3, %129, %cst_125 {dimension_numbers = #tpu.dot_dimension_numbers<[1], [0], [0], [1], [0, 0, 1, 1], [], []>} : vector<4x4xf32>, vector<4x16xf32>, vector<4x16xf32> -> vector<4x16xf32>
    %cst_126 = arith.constant dense<0.000000e+00> : vector<4x16xf32>
    %136 = tpu.matmul %7, %131, %cst_126 {dimension_numbers = #tpu.dot_dimension_numbers<[1], [0], [0], [1], [0, 0, 1, 1], [], []>} : vector<4x4xf32>, vector<4x16xf32>, vector<4x16xf32> -> vector<4x16xf32>
    %137 = arith.addf %135, %136 : vector<4x16xf32>
    %c15_i32_127 = arith.constant 15 : i32
    %138 = tpu.dynamic_rotate %137 by %c15_i32_127 dim 1 : vector<4x16xf32>, i32 -> vector<4x16xf32>
    %139 = arith.addf %134, %138 : vector<4x16xf32>
    %140 = vector.broadcast %8 : vector<4x1xf32> to vector<4x16xf32>
    %141 = arith.addf %139, %140 : vector<4x16xf32>
    %c0_128 = arith.constant 0 : index
    %c7_129 = arith.constant 7 : index
    %c0_130 = arith.constant 0 : index
    %c0_131 = arith.constant 0 : index
    %142 = vector.load %arg5[%c0_128, %c7_129, %c0_130, %c0_131] : memref<1x8x4x16xf32, #tpu.memory_space<vmem>>, vector<1x1x4x16xf32>
    %143 = vector.shape_cast %142 : vector<1x1x4x16xf32> to vector<4x16xf32>
    %144 = vector.shape_cast %141 : vector<4x16xf32> to vector<1x1x4x16xf32>
    tpu.vector_store %arg5[%c0_128, %c7_129, %c0_130, %c0_131], %144 {strides = array<i32>} : memref<1x8x4x16xf32, #tpu.memory_space<vmem>>, vector<1x1x4x16xf32>,
    return
  }
  func.func @transform_0(%arg0: i32, %arg1: i32) -> (i32, i32, i32, i32) {
    %c0_i32 = arith.constant 0 : i32
    %c0_i32_0 = arith.constant 0 : i32
    %c0_i32_1 = arith.constant 0 : i32
    return %arg0, %c0_i32, %arg1, %c0_i32_0 : i32, i32, i32, i32
  }
  func.func @transform_1(%arg0: i32, %arg1: i32) -> (i32, i32, i32) {
    %c0_i32 = arith.constant 0 : i32
    %c0_i32_0 = arith.constant 0 : i32
    %c0_i32_1 = arith.constant 0 : i32
    %c0_i32_2 = arith.constant 0 : i32
    return %c0_i32, %c0_i32_0, %c0_i32_1 : i32, i32, i32
  }
  func.func @transform_2(%arg0: i32, %arg1: i32) -> (i32, i32) {
    %c0_i32 = arith.constant 0 : i32
    %c0_i32_0 = arith.constant 0 : i32
    %c0_i32_1 = arith.constant 0 : i32
    return %c0_i32, %c0_i32_0 : i32, i32
  }
  func.func @transform_3(%arg0: i32, %arg1: i32) -> (i32, i32, i32, i32) {
    %c0_i32 = arith.constant 0 : i32
    %c0_i32_0 = arith.constant 0 : i32
    %c0_i32_1 = arith.constant 0 : i32
    return %arg0, %arg1, %c0_i32, %c0_i32_0 : i32, i32, i32, i32
  }
}

</mosaic_0001>

<bundles_post_ra>
// kernel: focus_downsample_2x.1
= control target key start
LH: loop header
LB: loop body
LE: loop exit
PB: predicated region body
PF: predicated region fallthrough
CT: control target
= control target key end

     0   :  { %8 = vsyncpa [#allocation3], 0  ;;  %s3966_s0 = inlined_call_operand.hbm [shape: f32[2,4,16,16], index: 0, kind: input, shape index: {}]   ;;  %s3967_s1 = inlined_call_operand.vmem [shape: f32[4,4,4], index: 1, kind: input, shape index: {}]   ;;  %s3968_s2 = inlined_call_operand.vmem [shape: f32[4,1], index: 2, kind: input, shape index: {}]   ;;  %s3969_s3 = inlined_call_operand.vmem [shape: f32[2,8,4,16], index: 3, kind: output, shape index: {}]  }
   0x1   :  { %10 = vsyncpa [#allocation3 + $0x1], 0  ;;  %s3437_s12 = smov 0   ;;  %s3439_s13 = smov 0  }
   0x2   :  { %s3441_s14 = smov 0   ;;  %s3443_s15 = smov 0  }
   0x3   :  { %s3445_s16 = smov 0   ;;  %s3447_s17 = smov 0  }
   0x4 LB: > { %s2953_s18 = sadd.s32 4294967295, %s3407_s17   ;;  %s28_s19 = sadd.s32 1, %s3403_s16  ;;  %s3407_s17 = sphi %s3447_s17, %s16_s17   ;;  %s3403_s16 = sphi %s3445_s16, %s3977_s16   ;;  %s3399_s15 = sphi %s3443_s15, %s3976_s15   ;;  %s3395_s14 = sphi %s3441_s14, %s3975_s14   ;;  %s3391_s13 = sphi %s3439_s13, %s3974_s13   ;;  %s3387_s12 = sphi %s3437_s12, %s3973_s12  }
   0x5   : > { %p30_p0 = scmp.ge.s32.totalorder %s28_s19, 2  ;;  %s37_s20 = sadd.s32 1, %s3395_s14 }
   0x6   : > { %p44_p1 = scmp.ne.s32.totalorder %s3395_s14, %s3391_s13  ;;  %p45_p2 = scmp.eq.s32.totalorder %s3407_s17, 0 }
   0x7   : > { %s3979_s19 = smov (%p30_p0, %s28_s19), 0  ;;  %p50_p4 = scmp.ne.s32.totalorder %s3391_s13, %s3387_s12 }
   0x8   : > { %p3473_p3 = por %p45_p2, %p44_p1  ;;  %s32_s22 = ssub.s32 %s3403_s16, %s3979_s19 }
   0x9   : > { %p51_p5 = scmp.eq.s32.totalorder %s2953_s18, 0  ;;  %p35_p6 = scmp.eq.s32.totalorder %s32_s22, 0 }
   0xa   : > { %p3272_p8 = scmp.lt.s32.totalorder %s3407_s17, 2  ;;  %s150_s25 = sand.u32 1, %s3395_s14  }
   0xb   : > { %p3480_p7 = por %p51_p5, %p50_p4  ;;  %s3040_s26 = sshll.u32 %s3403_s16, 10 }
   0xc   : > { %s3486_s24 = scalar_select %p35_p6, %s3395_s14, %s37_s20  }
   0xd   : > { %s2957_s27 = sshll.u32 %s150_s25, 6  ;;  %s162_s30 = scalar_lea.hbm %s3966_s0, %s3040_s26 }
   0xe   : > { %s154_s4 = scalar_lea.vmem [#allocation2], %s2957_s27  ;;  %p3495_p9 = pnand %p3272_p8, %p3473_p3 }
   0xf   : > { %s163_s5 = sshll.u32 %s154_s4, 4  ;;  %s151_s7 = scalar_lea.sflag [#allocation3], %s150_s25  ;;  %s164_s5 = int_to_ptr.vmem [resolvable:$true] %s163_s5 }
  0x10   : > { %p3331_p10 = pneg %p3495_p9  ;;  %s3342_s8 = scalar_lea.vmem %s164_s5, 1024 }
  0x11   : > { %p3343_p11 = scmp.ne.s32.totalorder %s164_s5, %s3342_s8  ;;  %s3409_s9 = smov [#allocation2]  }
  0x12   : > { %s3347_s10 = sshll.u32 %s3409_s9, 4  ;;  %s3348_s10 = int_to_ptr.vmem [resolvable:$false] %s3347_s10 }
  0x13   : > { %p3345_p12 = pnand %p3343_p11, %p3331_p10  ;;  %s3349_s11 = scalar_lea.vmem %s3348_s10, 2048 }
  0x14   : > { %p3350_p0 = scmp.lt.s32.totalorder %s164_s5, %s3348_s10  ;;  %p3351_p1 = scmp.lt.s32.totalorder %s3349_s11, %s3342_s8 }
  0x15   : > { %p3346_p13 = pneg %p3345_p12 }
  0x16   : > { %p3352_p2 = por %p3351_p1, %p3350_p0 }
  0x18   : > { %p3353_p3 = pnand %p3352_p2, %p3346_p13 }
  0x1a   : > { %3356 = shalt.err (!%p3353_p3)
}
  0x1b   : > { %s3410_s12 = smov 128   ;;  %s3411_s18 = smov 8  }
  0x1c   : > { %3271 = dma.hbm_to_vmem [thread:$0]  (!%p3495_p9), %s162_s30, 1024, %s164_s5, %s151_s7, %s3410_s12, %s3410_s12, %s3411_s18  }
  0x1d   : > { %p2960_p4 = scmp.ge.s32.totalorder %s3407_s17, 1  ;;  %p171_p5 = scmp.lt.s32.totalorder %s3407_s17, 3 }
  0x1f   : > { %p172_p6 = pnand %p2960_p4, %p171_p5 }
  0x20   : > { %s177_s20 = sand.u32 (!%p172_p6), 1, %s3391_s13  }
  0x21   : > { %175 = sbr.rel (%p172_p6) target bundleno = 656 (0x290), region = 32  ;;  %s2961_s21 = sshll.u32 (!%p172_p6), %s177_s20, 6 }
  0x22   : > { %s178_s22 = scalar_lea.sflag (!%p172_p6), [#allocation3], %s177_s20  ;;  %s3506_s25 = scalar_lea.vmem (!%p172_p6), [#allocation2], %s2961_s21 }
  0x26   : > { %3382 = dma.done.wait (%p3480_p7), %s178_s22, 1024  }
  0x27   : > { %3384 = vsyncadd (%p3480_p7), %s178_s22, 4294966272  ;;  %v3412_v0 = vmov 0.0   ;;  %vm3413_vm0 = vmmov 0   ;;  %vm240_vm1 = vcmask 1041409   ;;  %vm243_vm2 = vcmask 1042434   ;;  %s3414_s6 = smov 16  }
  0x28   : > { %3106 = vmatprep.subr.mxu0 %v3412_v0  ;;  %3111 = vmatprep.subr.mxu1 %v3412_v0  ;;  %v231_v1 = vld [vmem:[%s3506_s25 + $0x1] sm:$0x1]  ;;  %v232_v2 = vld [vmem:[%s3506_s25 + $0x11] sm:$0x1]  ;;  %v227_v7 = vld [vmem:[%s3506_s25] sm:$0x1] }
  0x29   : > { %3108 = vmatprep.mubr.msk.f32.mxu0 %vm3413_vm0, %v3412_v0  ;;  %3113 = vmatprep.mubr.msk.f32.mxu1 %vm3413_vm0, %v3412_v0  ;;  %v233_v3 = vld [vmem:[%s3506_s25 + $0x21] sm:$0x1]  ;;  %v234_v4 = vld [vmem:[%s3506_s25 + $0x31] sm:$0x1]  ;;  %v239_v5 = vrot.slane %v232_v2, 7  ;;  %vm246_vm3 = vcmask 1043459  }
  0x2a   : > { %v242_v6 = vrot.slane %v233_v3, 6  ;;  %v245_v8 = vrot.slane %v234_v4, 5  ;;  %v228_v9 = vld [vmem:[%s3506_s25 + $0x10] sm:$0x1]  ;;  %v229_v10 = vld [vmem:[%s3506_s25 + $0x20] sm:$0x1] }
  0x2b   : > { %v241_v11 = vsel %vm240_vm1, %v239_v5, %v231_v1  ;;  %vm252_vm4 = vcmask 1043456   ;;  %v230_v12 = vld [vmem:[%s3506_s25 + $0x30] sm:$0x1]  ;;  %v329_v13 = vrot.slane %v228_v9, 7  ;;  %v331_v14 = vrot.slane %v229_v10, 6  ;;  %s3416_s9 = smov 127  }
  0x2c   : > { %v244_v15 = vsel %vm243_vm2, %v242_v6, %v241_v11  ;;  %v333_v16 = vrot.slane %v230_v12, 5  ;;  %v3531_v17 = vld [vmem:[%s3967_s1 + $0x8] sm:$0xf]  ;;  %vm248_vm5 = vcmask 31744   ;;  %v3538_v20 = vld [vmem:[%s3967_s1] sm:$0xf] }
  0x2d   : > { %v247_v18 = vsel %vm246_vm3, %v245_v8, %v244_v15  ;;  %v330_v19 = vsel %vm240_vm1, %v329_v13, %v227_v7  ;;  %v580_v21 = vld [vmem:[%s3506_s25 + $0x3] sm:$0x1]  ;;  %v581_v22 = vld [vmem:[%s3506_s25 + $0x13] sm:$0x1]  ;;  %v3547_v24 = vld [vmem:[%s3967_s1 + $0xc] sm:$0xf] }
  0x2e   : > { %3107 = vmatpush3.msk.msra.mxu0 %vm252_vm4, %v247_v18  ;;  %v332_v23 = vsel %vm243_vm2, %v331_v14, %v330_v19  ;;  %v582_v25 = vld [vmem:[%s3506_s25 + $0x23] sm:$0x1]  ;;  %v583_v26 = vld [vmem:[%s3506_s25 + $0x33] sm:$0x1]  ;;  %v588_v27 = vrot.slane %v581_v22, 7  ;;  %vm556_vm6 = vcmask 1047680  }
  0x2f   : > { %v334_v28 = vsel %vm246_vm3, %v333_v16, %v332_v23  ;;  %3109 = vmatmul.mubr.msk.f32.vlgmr.msra.gmra.mxu0 %vm248_vm5, %v3531_v17  ;;  %3116 = vmatprep.subr.mxu0 %v3412_v0  ;;  %v590_v29 = vrot.slane %v582_v25, 6  ;;  %v592_v30 = vrot.slane %v583_v26, 5  ;;  %v576_v31 = vld [vmem:[%s3506_s25 + $0x2] sm:$0x1]  ;;  %v577_v32 = vld [vmem:[%s3506_s25 + $0x12] sm:$0x1] }
  0x30   : > { %3112 = vmatpush3.msk.msra.mxu1 %vm252_vm4, %v334_v28  ;;  %3117 = vmatpush3.msk.msra.mxu0 %vm252_vm4, %v247_v18  ;;  %v3562_v33 = vld [vmem:[%s3967_s1 + $0x4] sm:$0xf]  ;;  %v589_v34 = vsel %vm240_vm1, %v588_v27, %v580_v21  ;;  %v578_v35 = vld [vmem:[%s3506_s25 + $0x22] sm:$0x1]  ;;  %v579_v36 = vld [vmem:[%s3506_s25 + $0x32] sm:$0x1] }
  0x31   : > { %v670_v37 = vrot.slane %v577_v32, 7  ;;  %3114 = vmatmul.mubr.msk.f32.vlgmr.msra.gmra.mxu1 %vm248_vm5, %v3538_v20  ;;  %3121 = vmatprep.subr.mxu1 %v3412_v0  ;;  %v591_v38 = vsel %vm243_vm2, %v590_v29, %v589_v34  ;;  %v672_v39 = vrot.slane %v578_v35, 6  ;;  %v674_v40 = vrot.slane %v579_v36, 5  ;;  %v906_v41 = vld [vmem:[%s3506_s25 + $0x5] sm:$0x1]  ;;  %p210_p7 = scmp.lt.s32.totalorder %s3399_s15, 1 }
  0x32   : > { %v907_v42 = vld [vmem:[%s3506_s25 + $0x15] sm:$0x1]  ;;  %3122 = vmatpush3.msk.msra.mxu1 %vm252_vm4, %v334_v28  ;;  %3118 = vmatprep.mubr.msk.f32.mxu0 %vm3413_vm0, %v3412_v0  ;;  %v593_v43 = vsel %vm246_vm3, %v592_v30, %v591_v38  ;;  %v908_v45 = vld [vmem:[%s3506_s25 + $0x25] sm:$0x1]  ;;  %v902_v50 = vld [vmem:[%s3506_s25 + $0x4] sm:$0x1] }
  0x33   : > { %v671_v44 = vsel %vm240_vm1, %v670_v37, %v576_v31  ;;  %v909_v46 = vld [vmem:[%s3506_s25 + $0x35] sm:$0x1]  ;;  %v914_v47 = vrot.slane %v907_v42, 7  ;;  %3123 = vmatprep.mubr.msk.f32.mxu1 %vm3413_vm0, %v3412_v0  ;;  %3119 = vmatmul.mubr.msk.f32.vlgmr.msra.gmra.mxu0 %vm248_vm5, %v3547_v24  ;;  %v916_v49 = vrot.slane %v908_v45, 6  ;;  %v903_v51 = vld [vmem:[%s3506_s25 + $0x14] sm:$0x1] }
  0x34   : > { %v673_v48 = vsel %vm243_vm2, %v672_v39, %v671_v44  ;;  %3126 = vmatprep.subr.mxu0 %v3412_v0  ;;  %3131 = vmatprep.subr.mxu1 %v3412_v0  ;;  %v904_v54 = vld [vmem:[%s3506_s25 + $0x24] sm:$0x1]  ;;  %v905_v55 = vld [vmem:[%s3506_s25 + $0x34] sm:$0x1]  ;;  %v996_v56 = vrot.slane %v903_v51, 7  ;;  %v918_v59 = vrot.slane %v909_v46, 5 }
  0x35   : > { %v675_v52 = vsel %vm246_vm3, %v674_v40, %v673_v48  ;;  %v915_v53 = vsel %vm240_vm1, %v914_v47, %v906_v41  ;;  %3124 = vmatmul.mubr.msk.f32.vlgmr.msra.gmra.mxu1 %vm248_vm5, %v3562_v33  ;;  %3127 = vmatpush3.msk.msra.mxu0 %vm252_vm4, %v593_v43  ;;  %v998_v57 = vrot.slane %v904_v54, 6  ;;  %v1233_v58 = vld [vmem:[%s3506_s25 + $0x17] sm:$0x1]  ;;  %v1000_v62 = vrot.slane %v905_v55, 5  ;;  %v1229_v63 = vld [vmem:[%s3506_s25 + $0x16] sm:$0x1] }
  0x36   : > { %3132 = vmatpush3.msk.msra.mxu1 %vm252_vm4, %v675_v52  ;;  %3128 = vmatprep.mubr.msk.f32.mxu0 %vm3413_vm0, %v3412_v0  ;;  %v997_v60 = vsel %vm240_vm1, %v996_v56, %v902_v50  ;;  %v917_v61 = vsel %vm243_vm2, %v916_v49, %v915_v53  ;;  %v1234_v2 = vld [vmem:[%s3506_s25 + $0x27] sm:$0x1]  ;;  %v1240_v3 = vrot.slane %v1233_v58, 7  ;;  %v1230_v5 = vld [vmem:[%s3506_s25 + $0x26] sm:$0x1]  ;;  %v1322_v6 = vrot.slane %v1229_v63, 7 }
  0x37   : > { %3133 = vmatprep.mubr.msk.f32.mxu1 %vm3413_vm0, %v3412_v0  ;;  %3129 = vmatmul.mubr.msk.f32.vlgmr.msra.gmra.mxu0 %vm248_vm5, %v3531_v17  ;;  %v999_v1 = vsel %vm243_vm2, %v998_v57, %v997_v60  ;;  %v1232_v4 = vld [vmem:[%s3506_s25 + $0x7] sm:$0x1]  ;;  %v919_v7 = vsel %vm246_vm3, %v918_v59, %v917_v61  ;;  %v1228_v8 = vld [vmem:[%s3506_s25 + $0x6] sm:$0x1]  ;;  %v1235_v10 = vld [vmem:[%s3506_s25 + $0x37] sm:$0x1] }
  0x38   : > { %3136 = vmatprep.subr.mxu0 %v3412_v0  ;;  %3141 = vmatprep.subr.mxu1 %v3412_v0  ;;  %v1001_v9 = vsel %vm246_vm3, %v1000_v62, %v999_v1  ;;  %v1242_v11 = vrot.slane %v1234_v2, 6  ;;  %v1241_v12 = vsel %vm240_vm1, %v1240_v3, %v1232_v4  ;;  %v1231_v13 = vld [vmem:[%s3506_s25 + $0x36] sm:$0x1]  ;;  %v1324_v14 = vrot.slane %v1230_v5, 6  ;;  %v1559_v16 = vld [vmem:[%s3506_s25 + $0x19] sm:$0x1] }
  0x39   : > { %3134 = vmatmul.mubr.msk.f32.vlgmr.msra.gmra.mxu1 %vm248_vm5, %v3538_v20  ;;  %3137 = vmatpush3.msk.msra.mxu0 %vm252_vm4, %v593_v43  ;;  %v1323_v15 = vsel %vm240_vm1, %v1322_v6, %v1228_v8  ;;  %v1244_v18 = vrot.slane %v1235_v10, 5  ;;  %v1555_v19 = vld [vmem:[%s3506_s25 + $0x18] sm:$0x1]  ;;  %v1326_v22 = vrot.slane %v1231_v13, 5  ;;  %v1560_v25 = vld [vmem:[%s3506_s25 + $0x29] sm:$0x1] }
  0x3a   : > { %3142 = vmatpush3.msk.msra.mxu1 %vm252_vm4, %v675_v52  ;;  %3138 = vmatprep.mubr.msk.f32.mxu0 %vm3413_vm0, %v3412_v0  ;;  %v1243_v21 = vsel %vm243_vm2, %v1242_v11, %v1241_v12  ;;  %v1325_v23 = vsel %vm243_vm2, %v1324_v14, %v1323_v15  ;;  %v1566_v26 = vrot.slane %v1559_v16, 7  ;;  %v1558_v27 = vld [vmem:[%s3506_s25 + $0x9] sm:$0x1]  ;;  %v1556_v28 = vld [vmem:[%s3506_s25 + $0x28] sm:$0x1]  ;;  %v1648_v29 = vrot.slane %v1555_v19, 7 }
  0x3b   : > { %3143 = vmatprep.mubr.msk.f32.mxu1 %vm3413_vm0, %v3412_v0  ;;  %3139 = vmatmul.mubr.msk.f32.vlgmr.msra.gmra.mxu0 %vm248_vm5, %v3547_v24  ;;  %v1245_v30 = vsel %vm246_vm3, %v1244_v18, %v1243_v21  ;;  %v1554_v31 = vld [vmem:[%s3506_s25 + $0x8] sm:$0x1]  ;;  %v1327_v32 = vsel %vm246_vm3, %v1326_v22, %v1325_v23  ;;  %v1561_v34 = vld [vmem:[%s3506_s25 + $0x39] sm:$0x1]  ;;  %v1568_v35 = vrot.slane %v1560_v25, 6  ;;  %v1650_v38 = vrot.slane %v1556_v28, 6 }
  0x3c   : > { %3146 = vmatprep.subr.mxu0 %v3412_v0  ;;  %3151 = vmatprep.subr.mxu1 %v3412_v0  ;;  %v1567_v36 = vsel %vm240_vm1, %v1566_v26, %v1558_v27  ;;  %v1557_v37 = vld [vmem:[%s3506_s25 + $0x38] sm:$0x1]  ;;  %v1649_v39 = vsel %vm240_vm1, %v1648_v29, %v1554_v31  ;;  %v1885_v40 = vld [vmem:[%s3506_s25 + $0x1b] sm:$0x1]  ;;  %v1570_v41 = vrot.slane %v1561_v34, 5  ;;  %s3981_s15 = smov (!%p210_p7, %s3399_s15), 1 }
  0x3d   : > { %3144 = vmatmul.mubr.msk.f32.vlgmr.msra.gmra.mxu1 %vm248_vm5, %v3562_v33  ;;  %3147 = vmatpush3.msk.msra.mxu0 %vm252_vm4, %v919_v7  ;;  %v1881_v42 = vld [vmem:[%s3506_s25 + $0x1a] sm:$0x1]  ;;  %v1569_v43 = vsel %vm243_vm2, %v1568_v35, %v1567_v36  ;;  %v1652_v44 = vrot.slane %v1557_v37, 5  ;;  %v1651_v45 = vsel %vm243_vm2, %v1650_v38, %v1649_v39  ;;  %v1886_v46 = vld [vmem:[%s3506_s25 + $0x2b] sm:$0x1]  ;;  %v1892_v47 = vrot.slane %v1885_v40, 7 }
  0x3e   : > { %3152 = vmatpush3.msk.msra.mxu1 %vm252_vm4, %v1001_v9  ;;  %3148 = vmatprep.mubr.msk.f32.mxu0 %vm3413_vm0, %v3412_v0  ;;  %v1884_v48 = vld [vmem:[%s3506_s25 + $0xb] sm:$0x1]  ;;  %v1882_v49 = vld [vmem:[%s3506_s25 + $0x2a] sm:$0x1]  ;;  %v1974_v50 = vrot.slane %v1881_v42, 7  ;;  %v1571_v51 = vsel %vm246_vm3, %v1570_v41, %v1569_v43  ;;  %v1894_v55 = vrot.slane %v1886_v46, 6 }
  0x3f   : > { %3153 = vmatprep.mubr.msk.f32.mxu1 %vm3413_vm0, %v3412_v0  ;;  %3149 = vmatmul.mubr.msk.f32.vlgmr.msra.gmra.mxu0 %vm248_vm5, %v3531_v17  ;;  %v1880_v52 = vld [vmem:[%s3506_s25 + $0xa] sm:$0x1]  ;;  %v1653_v53 = vsel %vm246_vm3, %v1652_v44, %v1651_v45  ;;  %v1887_v54 = vld [vmem:[%s3506_s25 + $0x3b] sm:$0x1]  ;;  %v1893_v56 = vsel %vm240_vm1, %v1892_v47, %v1884_v48  ;;  %v1883_v57 = vld [vmem:[%s3506_s25 + $0x3a] sm:$0x1] }
  0x40   : > { %3156 = vmatprep.subr.mxu0 %v3412_v0  ;;  %3161 = vmatprep.subr.mxu1 %v3412_v0  ;;  %v1976_v58 = vrot.slane %v1882_v49, 6  ;;  %v1975_v59 = vsel %vm240_vm1, %v1974_v50, %v1880_v52  ;;  %v2211_v60 = vld [vmem:[%s3506_s25 + $0x1d] sm:$0x1]  ;;  %v1896_v61 = vrot.slane %v1887_v54, 5  ;;  %v2207_v62 = vld [vmem:[%s3506_s25 + $0x1c] sm:$0x1]  ;;  %v1895_v63 = vsel %vm243_vm2, %v1894_v55, %v1893_v56 }
  0x41   : > { %3154 = vmatmul.mubr.msk.f32.vlgmr.msra.gmra.mxu1 %vm248_vm5, %v3538_v20  ;;  %3157 = vmatpush3.msk.msra.mxu0 %vm252_vm4, %v919_v7  ;;  %v1978_v1 = vrot.slane %v1883_v57, 5  ;;  %v2212_v3 = vld [vmem:[%s3506_s25 + $0x2d] sm:$0x1]  ;;  %v2218_v4 = vrot.slane %v2211_v60, 7  ;;  %v2208_v6 = vld [vmem:[%s3506_s25 + $0x2c] sm:$0x1] }
  0x42   : > { %3162 = vmatpush3.msk.msra.mxu1 %vm252_vm4, %v1001_v9  ;;  %3158 = vmatprep.mubr.msk.f32.mxu0 %vm3413_vm0, %v3412_v0  ;;  %v1977_v2 = vsel %vm243_vm2, %v1976_v58, %v1975_v59  ;;  %v2210_v5 = vld [vmem:[%s3506_s25 + $0xd] sm:$0x1]  ;;  %v2300_v7 = vrot.slane %v2207_v62, 7  ;;  %v1897_v8 = vsel %vm246_vm3, %v1896_v61, %v1895_v63  ;;  %v2206_v9 = vld [vmem:[%s3506_s25 + $0xc] sm:$0x1]  ;;  %v2220_v12 = vrot.slane %v2212_v3, 6 }
  0x43   : > { %3163 = vmatprep.mubr.msk.f32.mxu1 %vm3413_vm0, %v3412_v0  ;;  %3159 = vmatmul.mubr.msk.f32.vlgmr.msra.gmra.mxu0 %vm248_vm5, %v3547_v24  ;;  %v1979_v10 = vsel %vm246_vm3, %v1978_v1, %v1977_v2  ;;  %v2213_v11 = vld [vmem:[%s3506_s25 + $0x3d] sm:$0x1]  ;;  %v2219_v13 = vsel %vm240_vm1, %v2218_v4, %v2210_v5  ;;  %v2209_v14 = vld [vmem:[%s3506_s25 + $0x3c] sm:$0x1]  ;;  %v2302_v15 = vrot.slane %v2208_v6, 6  ;;  %s3041_s10 = sshll.u32 %s3981_s15, 5 }
  0x44   : > { %3166 = vmatprep.subr.mxu0 %v3412_v0  ;;  %3171 = vmatprep.subr.mxu1 %v3412_v0  ;;  %v2301_v16 = vsel %vm240_vm1, %v2300_v7, %v2206_v9  ;;  %v2537_v18 = vld [vmem:[%s3506_s25 + $0x1f] sm:$0x1]  ;;  %v2222_v19 = vrot.slane %v2213_v11, 5  ;;  %v2533_v21 = vld [vmem:[%s3506_s25 + $0x1e] sm:$0x1]  ;;  %v2221_v22 = vsel %vm243_vm2, %v2220_v12, %v2219_v13  ;;  %v2304_v23 = vrot.slane %v2209_v14, 5  ;;  %s3923_s18 = scalar_lea.vmem %s3969_s3, %s3041_s10 }
  0x45   : > { %3164 = vmatmul.mubr.msk.f32.vlgmr.msra.gmra.mxu1 %vm248_vm5, %v3562_v33  ;;  %3167 = vmatpush3.msk.msra.mxu0 %vm252_vm4, %v1245_v30  ;;  %v2303_v25 = vsel %vm243_vm2, %v2302_v15, %v2301_v16  ;;  %v2538_v26 = vld [vmem:[%s3506_s25 + $0x2f] sm:$0x1]  ;;  %v2544_v27 = vrot.slane %v2537_v18, 7  ;;  %v2534_v29 = vld [vmem:[%s3506_s25 + $0x2e] sm:$0x1]  ;;  %vm574_vm7 = vcmask 125952  }
  0x46   : > { %3172 = vmatpush3.msk.msra.mxu1 %vm252_vm4, %v1327_v32  ;;  %3168 = vmatprep.mubr.msk.f32.mxu0 %vm3413_vm0, %v3412_v0  ;;  %v2536_v28 = vld [vmem:[%s3506_s25 + $0xf] sm:$0x1]  ;;  %v2223_v31 = vsel %vm246_vm3, %v2222_v19, %v2221_v22  ;;  %v2305_v34 = vsel %vm246_vm3, %v2304_v23, %v2303_v25  ;;  %v2539_v35 = vld [vmem:[%s3506_s25 + $0x3f] sm:$0x1]  ;;  %v2546_v36 = vrot.slane %v2538_v26, 6  ;;  %v2628_v39 = vrot.slane %v2534_v29, 6 }
  0x47   : > { %3173 = vmatprep.mubr.msk.f32.mxu1 %vm3413_vm0, %v3412_v0  ;;  %3169 = vmatmul.mubr.msk.f32.vlgmr.msra.gmra.mxu0 %vm248_vm5, %v3531_v17  ;;  %v2545_v37 = vsel %vm240_vm1, %v2544_v27, %v2536_v28  ;;  %v2535_v38 = vld [vmem:[%s3506_s25 + $0x3e] sm:$0x1]  ;;  %v2548_v41 = vrot.slane %v2539_v35, 5 }
  0x48   : > { %3176 = vmatprep.subr.mxu0 %v3412_v0  ;;  %3181 = vmatprep.subr.mxu1 %v3412_v0  ;;  %v2547_v42 = vsel %vm243_vm2, %v2546_v36, %v2545_v37  ;;  %v2630_v43 = vrot.slane %v2535_v38, 5 }
  0x49   : > { %3174 = vmatmul.mubr.msk.f32.vlgmr.msra.gmra.mxu1 %vm248_vm5, %v3538_v20  ;;  %3177 = vmatpush3.msk.msra.mxu0 %vm252_vm4, %v1245_v30  ;;  %v2626_v30 = vrot.slane %v2533_v21, 7  ;;  %v2549_v45 = vsel %vm246_vm3, %v2548_v41, %v2547_v42 }
  0x4a   : > { %3182 = vmatpush3.msk.msra.mxu1 %vm252_vm4, %v1327_v32  ;;  %3178 = vmatprep.mubr.msk.f32.mxu0 %vm3413_vm0, %v3412_v0  ;;  %v2532_v32 = vld [vmem:[%s3506_s25 + $0xe] sm:$0x1] }
  0x4b   : > { %3183 = vmatprep.mubr.msk.f32.mxu1 %vm3413_vm0, %v3412_v0  ;;  %3179 = vmatmul.mubr.msk.f32.vlgmr.msra.gmra.mxu0 %vm248_vm5, %v3547_v24  ;;  %v2627_v40 = vsel %vm240_vm1, %v2626_v30, %v2532_v32 }
  0x4c   : > { %3186 = vmatprep.subr.mxu0 %v3412_v0  ;;  %3191 = vmatprep.subr.mxu1 %v3412_v0  ;;  %v2629_v44 = vsel %vm243_vm2, %v2628_v39, %v2627_v40 }
  0x4d   : > { %3184 = vmatmul.mubr.msk.f32.vlgmr.msra.gmra.mxu1 %vm248_vm5, %v3562_v33  ;;  %3187 = vmatpush3.msk.msra.mxu0 %vm252_vm4, %v1571_v51  ;;  %v2631_v46 = vsel %vm246_vm3, %v2630_v43, %v2629_v44 }
  0x4e   : > { %3192 = vmatpush3.msk.msra.mxu1 %vm252_vm4, %v1653_v53  ;;  %3188 = vmatprep.mubr.msk.f32.mxu0 %vm3413_vm0, %v3412_v0 }
  0x4f   : > { %3193 = vmatprep.mubr.msk.f32.mxu1 %vm3413_vm0, %v3412_v0  ;;  %3189 = vmatmul.mubr.msk.f32.vlgmr.msra.gmra.mxu0 %vm248_vm5, %v3531_v17 }
  0x50   : > { %3196 = vmatprep.subr.mxu0 %v3412_v0  ;;  %3201 = vmatprep.subr.mxu1 %v3412_v0 }
  0x51   : > { %3194 = vmatmul.mubr.msk.f32.vlgmr.msra.gmra.mxu1 %vm248_vm5, %v3538_v20  ;;  %3197 = vmatpush3.msk.msra.mxu0 %vm252_vm4, %v1571_v51 }
  0x52   : > { %3202 = vmatpush3.msk.msra.mxu1 %vm252_vm4, %v1653_v53  ;;  %3198 = vmatprep.mubr.msk.f32.mxu0 %vm3413_vm0, %v3412_v0 }
  0x53   : > { %3203 = vmatprep.mubr.msk.f32.mxu1 %vm3413_vm0, %v3412_v0  ;;  %3199 = vmatmul.mubr.msk.f32.vlgmr.msra.gmra.mxu0 %vm248_vm5, %v3547_v24 }
  0x54   : > { %3206 = vmatprep.subr.mxu0 %v3412_v0  ;;  %3211 = vmatprep.subr.mxu1 %v3412_v0 }
  0x55   : > { %3204 = vmatmul.mubr.msk.f32.vlgmr.msra.gmra.mxu1 %vm248_vm5, %v3562_v33  ;;  %3207 = vmatpush3.msk.msra.mxu0 %vm252_vm4, %v1897_v8 }
  0x56   : > { %3212 = vmatpush3.msk.msra.mxu1 %vm252_vm4, %v1979_v10  ;;  %3208 = vmatprep.mubr.msk.f32.mxu0 %vm3413_vm0, %v3412_v0 }
  0x57   : > { %3213 = vmatprep.mubr.msk.f32.mxu1 %vm3413_vm0, %v3412_v0  ;;  %3209 = vmatmul.mubr.msk.f32.vlgmr.msra.gmra.mxu0 %vm248_vm5, %v3531_v17 }
  0x58   : > { %3216 = vmatprep.subr.mxu0 %v3412_v0  ;;  %3221 = vmatprep.subr.mxu1 %v3412_v0 }
  0x59   : > { %3214 = vmatmul.mubr.msk.f32.vlgmr.msra.gmra.mxu1 %vm248_vm5, %v3538_v20  ;;  %3217 = vmatpush3.msk.msra.mxu0 %vm252_vm4, %v1897_v8 }
  0x5a   : > { %3222 = vmatpush3.msk.msra.mxu1 %vm252_vm4, %v1979_v10  ;;  %3218 = vmatprep.mubr.msk.f32.mxu0 %vm3413_vm0, %v3412_v0 }
  0x5b   : > { %3223 = vmatprep.mubr.msk.f32.mxu1 %vm3413_vm0, %v3412_v0  ;;  %3219 = vmatmul.mubr.msk.f32.vlgmr.msra.gmra.mxu0 %vm248_vm5, %v3547_v24 }
  0x5c   : > { %3226 = vmatprep.subr.mxu0 %v3412_v0  ;;  %3231 = vmatprep.subr.mxu1 %v3412_v0 }
  0x5d   : > { %3224 = vmatmul.mubr.msk.f32.vlgmr.msra.gmra.mxu1 %vm248_vm5, %v3562_v33  ;;  %3227 = vmatpush3.msk.msra.mxu0 %vm252_vm4, %v2223_v31 }
  0x5e   : > { %3232 = vmatpush3.msk.msra.mxu1 %vm252_vm4, %v2305_v34  ;;  %3228 = vmatprep.mubr.msk.f32.mxu0 %vm3413_vm0, %v3412_v0 }
  0x5f   : > { %3233 = vmatprep.mubr.msk.f32.mxu1 %vm3413_vm0, %v3412_v0  ;;  %3229 = vmatmul.mubr.msk.f32.vlgmr.msra.gmra.mxu0 %vm248_vm5, %v3531_v17 }
  0x60   : > { %3236 = vmatprep.subr.mxu0 %v3412_v0  ;;  %3241 = vmatprep.subr.mxu1 %v3412_v0 }
  0x61   : > { %3234 = vmatmul.mubr.msk.f32.vlgmr.msra.gmra.mxu1 %vm248_vm5, %v3538_v20  ;;  %3237 = vmatpush3.msk.msra.mxu0 %vm252_vm4, %v2223_v31 }
  0x62   : > { %3242 = vmatpush3.msk.msra.mxu1 %vm252_vm4, %v2305_v34  ;;  %3238 = vmatprep.mubr.msk.f32.mxu0 %vm3413_vm0, %v3412_v0 }
  0x63   : > { %3243 = vmatprep.mubr.msk.f32.mxu1 %vm3413_vm0, %v3412_v0  ;;  %3239 = vmatmul.mubr.msk.f32.vlgmr.msra.gmra.mxu0 %vm248_vm5, %v3547_v24 }
  0x64   : > { %3246 = vmatprep.subr.mxu0 %v3412_v0  ;;  %3251 = vmatprep.subr.mxu1 %v3412_v0 }
  0x65   : > { %3244 = vmatmul.mubr.msk.f32.vlgmr.msra.gmra.mxu1 %vm248_vm5, %v3562_v33  ;;  %3247 = vmatpush3.msk.msra.mxu0 %vm252_vm4, %v2549_v45 }
  0x66   : > { %3252 = vmatpush3.msk.msra.mxu1 %vm252_vm4, %v2631_v46  ;;  %3248 = vmatprep.mubr.msk.f32.mxu0 %vm3413_vm0, %v3412_v0 }
  0x67   : > { %3253 = vmatprep.mubr.msk.f32.mxu1 %vm3413_vm0, %v3412_v0  ;;  %3249 = vmatmul.mubr.msk.f32.vlgmr.msra.gmra.mxu0 %vm248_vm5, %v3531_v17 }
  0x68   : > { %3256 = vmatprep.subr.mxu0 %v3412_v0  ;;  %3261 = vmatprep.subr.mxu1 %v3412_v0 }
  0x69   : > { %3254 = vmatmul.mubr.msk.f32.vlgmr.msra.gmra.mxu1 %vm248_vm5, %v3538_v20  ;;  %3257 = vmatpush3.msk.msra.mxu0 %vm252_vm4, %v2549_v45 }
  0x6a   : > { %3262 = vmatpush3.msk.msra.mxu1 %vm252_vm4, %v2631_v46  ;;  %3258 = vmatprep.mubr.msk.f32.mxu0 %vm3413_vm0, %v3412_v0 }
  0x6b   : > { %3263 = vmatprep.mubr.msk.f32.mxu1 %vm3413_vm0, %v3412_v0  ;;  %3259 = vmatmul.mubr.msk.f32.vlgmr.msra.gmra.mxu0 %vm248_vm5, %v3547_v24 }
  0x6d   : > { %3264 = vmatmul.mubr.msk.f32.vlgmr.msra.gmra.mxu1 %vm248_vm5, %v3562_v33 }
  0xef   : > { %v321_v17 = vpop.f32.mrf.mxu0 }
  0xf1   : > { %v406_v47 = vpop.f32.mrf.mxu1  ;;  %v3110_v48 = vpop.f32.mrf.mxu0 }
  0xf2   : > { %v3836_v20 = vadd.f32 %v406_v47, %v321_v17 }
  0xf3   : > { %v3115_v49 = vpop.f32.mrf.mxu1  ;;  %v479_v50 = vpop.f32.mrf.mxu0 }
  0xf5   : > { %v552_v51 = vpop.f32.mrf.mxu1  ;;  %v3120_v52 = vpop.f32.mrf.mxu0 }
  0xf6   : > { %v3838_v53 = vadd.f32 %v552_v51, %v479_v50  ;;  %v3415_v50 = vmov 0  }
  0xf7   : > { %v3125_v54 = vpop.f32.mrf.mxu1  ;;  %v662_v55 = vpop.f32.mrf.mxu0  ;;  %3328 = vset.pattern.permute.xlu0 %v3415_v50 }
  0xf8   : > { %557 = vrot.lane.b32.xlu0 %v3838_v53, %s3414_s6 }
  0xf9   : > { %v744_v0 = vpop.f32.mrf.mxu1  ;;  %v3130_v24 = vpop.f32.mrf.mxu0 }
  0xfa   : > { %v3842_v33 = vadd.f32 %v744_v0, %v662_v55 }
  0xfb   : > { %v3135_v56 = vpop.f32.mrf.mxu1  ;;  %v814_v57 = vpop.f32.mrf.mxu0 }
  0xfd   : > { %v884_v58 = vpop.f32.mrf.mxu1  ;;  %v3140_v59 = vpop.f32.mrf.mxu0 }
  0xfe   : > { %v3844_v60 = vadd.f32 %v884_v58, %v814_v57 }
  0xff   : > { %v3145_v61 = vpop.f32.mrf.mxu1  ;;  %v988_v62 = vpop.f32.mrf.mxu0 }
 0x100   : > { %888 = vrot.lane.b32.xlu0 %v3844_v60, %s3414_s6 }
 0x101   : > { %v1070_v63 = vpop.f32.mrf.mxu1  ;;  %v3150_v1 = vpop.f32.mrf.mxu0 }
 0x102   : > { %v3848_v2 = vadd.f32 %v1070_v63, %v988_v62 }
 0x103   : > { %v3155_v3 = vpop.f32.mrf.mxu1  ;;  %v1140_v4 = vpop.f32.mrf.mxu0 }
 0x105   : > { %v1210_v5 = vpop.f32.mrf.mxu1  ;;  %v3160_v6 = vpop.f32.mrf.mxu0 }
 0x106   : > { %v3850_v7 = vadd.f32 %v1210_v5, %v1140_v4 }
 0x107   : > { %v3165_v8 = vpop.f32.mrf.mxu1  ;;  %v1314_v9 = vpop.f32.mrf.mxu0 }
 0x108   : > { %1214 = vrot.lane.b32.xlu1 %v3850_v7, %s3414_s6 }
 0x109   : > { %v1396_v10 = vpop.f32.mrf.mxu1  ;;  %v3170_v11 = vpop.f32.mrf.mxu0 }
 0x10a   : > { %v3854_v12 = vadd.f32 %v1396_v10, %v1314_v9 }
 0x10b   : > { %v3175_v13 = vpop.f32.mrf.mxu1  ;;  %v1466_v14 = vpop.f32.mrf.mxu0 }
 0x10d   : > { %v1536_v15 = vpop.f32.mrf.mxu1  ;;  %v3180_v16 = vpop.f32.mrf.mxu0 }
 0x10e   : > { %v3856_v18 = vadd.f32 %v1536_v15, %v1466_v14 }
 0x10f   : > { %v3185_v19 = vpop.f32.mrf.mxu1  ;;  %v1640_v21 = vpop.f32.mrf.mxu0 }
 0x110   : > { %1540 = vrot.lane.b32.xlu1 %v3856_v18, %s3414_s6  ;;  %v226_v19 = vld [vmem:[%s3968_s2] sm:$0xf] }
 0x111   : > { %v1722_v22 = vpop.f32.mrf.mxu1  ;;  %v3190_v23 = vpop.f32.mrf.mxu0 }
 0x112   : > { %v3860_v25 = vadd.f32 %v1722_v22, %v1640_v21 }
 0x113   : > { %v3195_v26 = vpop.f32.mrf.mxu1  ;;  %v1792_v27 = vpop.f32.mrf.mxu0 }
 0x115   : > { %v1862_v28 = vpop.f32.mrf.mxu1  ;;  %v3200_v29 = vpop.f32.mrf.mxu0 }
 0x116   : > { %v3862_v30 = vadd.f32 %v1862_v28, %v1792_v27 }
 0x117   : > { %v3205_v31 = vpop.f32.mrf.mxu1  ;;  %v1966_v32 = vpop.f32.mrf.mxu0 }
 0x118   : > { %1866 = vrot.lane.b32.xlu0 %v3862_v30, %s3414_s6 }
 0x119   : > { %v2048_v34 = vpop.f32.mrf.mxu1  ;;  %v3210_v35 = vpop.f32.mrf.mxu0 }
 0x11a   : > { %v3866_v36 = vadd.f32 %v2048_v34, %v1966_v32 }
 0x11b   : > { %v3215_v37 = vpop.f32.mrf.mxu1  ;;  %v2118_v38 = vpop.f32.mrf.mxu0 }
 0x11d   : > { %v2188_v39 = vpop.f32.mrf.mxu1  ;;  %v3220_v40 = vpop.f32.mrf.mxu0 }
 0x11e   : > { %v3868_v41 = vadd.f32 %v2188_v39, %v2118_v38 }
 0x11f   : > { %v3225_v42 = vpop.f32.mrf.mxu1  ;;  %v2292_v43 = vpop.f32.mrf.mxu0 }
 0x120   : > { %2192 = vrot.lane.b32.xlu1 %v3868_v41, %s3414_s6 }
 0x121   : > { %v2374_v44 = vpop.f32.mrf.mxu1  ;;  %v3230_v45 = vpop.f32.mrf.mxu0 }
 0x122   : > { %v3872_v46 = vadd.f32 %v2374_v44, %v2292_v43 }
 0x123   : > { %v3235_v17 = vpop.f32.mrf.mxu1  ;;  %v2444_v47 = vpop.f32.mrf.mxu0 }
 0x125   : > { %v2514_v48 = vpop.f32.mrf.mxu1  ;;  %v3240_v49 = vpop.f32.mrf.mxu0 }
 0x126   : > { %v2515_v51 = vadd.f32 %v2514_v48, %v2444_v47 }
 0x127   : > { %v3245_v52 = vpop.f32.mrf.mxu1  ;;  %v2618_v54 = vpop.f32.mrf.mxu0 }
 0x128   : > { %2518 = vrot.lane.b32.xlu0 %v2515_v51, %s3414_s6 }
 0x129   : > { %v2700_v55 = vpop.f32.mrf.mxu1  ;;  %v3250_v0 = vpop.f32.mrf.mxu0 }
 0x12a   : > { %v3875_v24 = vadd.f32 %v2700_v55, %v2618_v54 }
 0x12b   : > { %v3255_v56 = vpop.f32.mrf.mxu1  ;;  %v2770_v57 = vpop.f32.mrf.mxu0 }
 0x12d   : > { %v2840_v58 = vpop.f32.mrf.mxu1  ;;  %v3260_v59 = vpop.f32.mrf.mxu0 }
 0x12e   : > { %v2841_v61 = vadd.f32 %v2840_v58, %v2770_v57 }
 0x12f   : > { %v3265_v62 = vpop.f32.mrf.mxu1 }
 0x130   : > { %2844 = vrot.lane.b32.xlu1 %v2841_v61, %s3414_s6 }
 0x16a   : > { %v558_v63 = vpop.permute.xlu0 %557 }
 0x16b   : > { %v559_v1 = vsel %vm556_vm6, %v558_v63, %v3838_v53 }
 0x16c   : > { %560 = vrot.lane.b32.xlu0 %v559_v1, %s3414_s6 }
 0x172   : > { %v889_v3 = vpop.permute.xlu0 %888 }
 0x173   : > { %v890_v4 = vsel %vm556_vm6, %v889_v3, %v3844_v60 }
 0x174   : > { %891 = vrot.lane.b32.xlu1 %v890_v4, %s3414_s6 }
 0x17a   : > { %v1215_v5 = vpop.permute.xlu1 %1214 }
 0x17b   : > { %v1216_v6 = vsel %vm556_vm6, %v1215_v5, %v3850_v7 }
 0x17c   : > { %1217 = vrot.lane.b32.xlu0 %v1216_v6, %s3414_s6 }
 0x182   : > { %v1541_v8 = vpop.permute.xlu1 %1540 }
 0x183   : > { %v1542_v9 = vsel %vm556_vm6, %v1541_v8, %v3856_v18 }
 0x184   : > { %1543 = vrot.lane.b32.xlu1 %v1542_v9, %s3414_s6 }
 0x18a   : > { %v1867_v10 = vpop.permute.xlu0 %1866 }
 0x18b   : > { %v1868_v11 = vsel %vm556_vm6, %v1867_v10, %v3862_v30 }
 0x18c   : > { %1869 = vrot.lane.b32.xlu0 %v1868_v11, %s3414_s6 }
 0x192   : > { %v2193_v13 = vpop.permute.xlu1 %2192 }
 0x193   : > { %v2194_v14 = vsel %vm556_vm6, %v2193_v13, %v3868_v41 }
 0x194   : > { %2195 = vrot.lane.b32.xlu1 %v2194_v14, %s3414_s6 }
 0x19a   : > { %v2519_v15 = vpop.permute.xlu0 %2518 }
 0x19b   : > { %v2520_v16 = vsel %vm556_vm6, %v2519_v15, %v2515_v51 }
 0x19c   : > { %2521 = vrot.lane.b32.xlu0 %v2520_v16, %s3414_s6 }
 0x1a0   : > { %570 = vperm.xlu0 %3328, %v226_v19  }
 0x1a2   : > { %v2845_v21 = vpop.permute.xlu1 %2844 }
 0x1a3   : > { %v2846_v22 = vsel %vm556_vm6, %v2845_v21, %v2841_v61 }
 0x1a4   : > { %2847 = vrot.lane.b32.xlu1 %v2846_v22, %s3414_s6 }
 0x1de   : > { %v561_v23 = vpop.permute.xlu0 %560 }
 0x1df   : > { %v562_v26 = vsel %vm556_vm6, %v561_v23, %v3838_v53 }
 0x1e0   : > { %564 = vrot.lane.b32.xlu1 %v562_v26, %s3416_s9 }
 0x1e6   : > { %v892_v27 = vpop.permute.xlu1 %891 }
 0x1e7   : > { %v893_v28 = vsel %vm556_vm6, %v892_v27, %v3844_v60 }
 0x1e8   : > { %895 = vrot.lane.b32.xlu1 %v893_v28, %s3416_s9 }
 0x1ee   : > { %v1218_v29 = vpop.permute.xlu0 %1217 }
 0x1ef   : > { %v1219_v31 = vsel %vm556_vm6, %v1218_v29, %v3850_v7 }
 0x1f0   : > { %1221 = vrot.lane.b32.xlu0 %v1219_v31, %s3416_s9 }
 0x1f6   : > { %v1544_v32 = vpop.permute.xlu1 %1543 }
 0x1f7   : > { %v1545_v34 = vsel %vm556_vm6, %v1544_v32, %v3856_v18 }
 0x1f8   : > { %1547 = vrot.lane.b32.xlu1 %v1545_v34, %s3416_s9 }
 0x1fe   : > { %v1870_v53 = vpop.permute.xlu0 %1869 }
 0x1ff   : > { %v1871_v35 = vsel %vm556_vm6, %v1870_v53, %v3862_v30 }
 0x200   : > { %1873 = vrot.lane.b32.xlu0 %v1871_v35, %s3416_s9 }
 0x206   : > { %v2196_v37 = vpop.permute.xlu1 %2195 }
 0x207   : > { %v2197_v60 = vsel %vm556_vm6, %v2196_v37, %v3868_v41 }
 0x208   : > { %2199 = vrot.lane.b32.xlu1 %v2197_v60, %s3416_s9 }
 0x20e   : > { %v2522_v38 = vpop.permute.xlu0 %2521 }
 0x20f   : > { %v2523_v7 = vsel %vm556_vm6, %v2522_v38, %v2515_v51 }
 0x210   : > { %2525 = vrot.lane.b32.xlu0 %v2523_v7, %s3416_s9 }
 0x216   : > { %v2848_v39 = vpop.permute.xlu1 %2847 }
 0x217   : > { %v2849_v40 = vsel %vm556_vm6, %v2848_v39, %v2841_v61 }
 0x218   : > { %2851 = vrot.lane.b32.xlu1 %v2849_v40, %s3416_s9 }
 0x21b   : > { %v571_v42 = vpop.permute.xlu0 %570 }
 0x252   : > { %v565_v18 = vpop.permute.xlu1 %564 }
 0x253   : > { %v567_v30 = vadd.f32 %v565_v18, %v3836_v20 }
 0x255   : > { %v573_v41 = vadd.f32 %v571_v42, %v567_v30 }
 0x257   : > { %575 = vst.msk [vmem:[%s3923_s18] sm:$0xf] %vm574_vm7, %v573_v41 }
 0x25a   : > { %v896_v43 = vpop.permute.xlu1 %895 }
 0x25b   : > { %v898_v44 = vadd.f32 %v896_v43, %v3842_v33 }
 0x25d   : > { %v899_v45 = vadd.f32 %v898_v44, %v571_v42 }
 0x25f   : > { %2983 = vst.msk [vmem:[%s3923_s18 + $0x4] sm:$0xf] %vm574_vm7, %v899_v45 }
 0x262   : > { %v1222_v20 = vpop.permute.xlu0 %1221 }
 0x263   : > { %v1224_v17 = vadd.f32 %v1222_v20, %v3848_v2 }
 0x265   : > { %v1225_v47 = vadd.f32 %v1224_v17, %v571_v42 }
 0x267   : > { %2992 = vst.msk [vmem:[%s3923_s18 + $0x8] sm:$0xf] %vm574_vm7, %v1225_v47 }
 0x26a   : > { %v1548_v48 = vpop.permute.xlu1 %1547 }
 0x26b   : > { %v1550_v49 = vadd.f32 %v1548_v48, %v3854_v12 }
 0x26d   : > { %v1551_v50 = vadd.f32 %v1550_v49, %v571_v42 }
 0x26f   : > { %3001 = vst.msk [vmem:[%s3923_s18 + $0xc] sm:$0xf] %vm574_vm7, %v1551_v50 }
 0x272   : > { %v1874_v51 = vpop.permute.xlu0 %1873 }
 0x273   : > { %v1876_v33 = vadd.f32 %v1874_v51, %v3860_v25 }
 0x275   : > { %v1877_v52 = vadd.f32 %v1876_v33, %v571_v42 }
 0x277   : > { %3010 = vst.msk [vmem:[%s3923_s18 + $0x10] sm:$0xf] %vm574_vm7, %v1877_v52 }
 0x27a   : > { %v2200_v54 = vpop.permute.xlu1 %2199 }
 0x27b   : > { %v2202_v2 = vadd.f32 %v2200_v54, %v3866_v36 }
 0x27d   : > { %v2203_v55 = vadd.f32 %v2202_v2, %v571_v42 }
 0x27f   : > { %3019 = vst.msk [vmem:[%s3923_s18 + $0x14] sm:$0xf] %vm574_vm7, %v2203_v55 }
 0x282   : > { %v2526_v0 = vpop.permute.xlu0 %2525 }
 0x283   : > { %v2528_v56 = vadd.f32 %v2526_v0, %v3872_v46 }
 0x285   : > { %v2529_v12 = vadd.f32 %v2528_v56, %v571_v42 }
 0x287   : > { %3028 = vst.msk [vmem:[%s3923_s18 + $0x18] sm:$0xf] %vm574_vm7, %v2529_v12 }
 0x28a   : > { %v2852_v57 = vpop.permute.xlu1 %2851 }
 0x28b   : > { %v2854_v58 = vadd.f32 %v2852_v57, %v3875_v24 }
 0x28d   : > { %v2855_v59 = vadd.f32 %v2854_v58, %v571_v42 }
 0x28f   : > { %3037 = vst.msk [vmem:[%s3923_s18 + $0x1c] sm:$0xf] %vm574_vm7, %v2855_v59 }
 0x290 PF: > { %s16_s17 = sadd.s32 1, %s3407_s17   ;;  %s3973_s12 = smov %s3391_s13 }
 0x291   : > { %p13_p8 = scmp.ge.s32.totalorder %s16_s17, 4   ;;  %s3974_s13 = smov %s3395_s14 }
 0x292   : > { %s3975_s14 = smov %s3486_s24  ;;  %s3976_s15 = smov %s3403_s16 }
 0x293   : > { %s3977_s16 = smov %s3979_s19  ;;  %15 = sbr.rel (!%p13_p8) target bundleno = 4 (0x4), region = 82 }
 0x298   :  { %2888 = vsyncpa [#allocation3], 1 }
 0x299   :  { %2890 = vsyncpa [#allocation3 + $0x1], 1 }

</bundles_post_ra>
